<compile_context>
chip_gen: v6e
topology: v6e:2x2x1
jax: 0.10.0
libtpu: 0.0.40
codegen_flags: <defaults>
</compile_context>

<pallas_src>
from functools import partial

import numpy as np
import jax
import jax.numpy as jnp
from jax.experimental import pallas as pl
from jax.experimental.pallas import tpu as pltpu

# ---------------- model configuration (matches the PyTorch module usage) --------------
INPUT_SHAPE = (4, 16, 16)        # (C, H, W)
PATCH_SHAPE = (8, 8)
HIDDEN_DIM = 32
NUM_HEADS = 2
NUM_ENCODERS = 1
OUTPUT_DIM = 10

VER_PATCHES = INPUT_SHAPE[1] // PATCH_SHAPE[0]
HOR_PATCHES = INPUT_SHAPE[2] // PATCH_SHAPE[1]
NUM_PATCHES = VER_PATCHES * HOR_PATCHES                    # 4
DIM_PATCH = PATCH_SHAPE[0] * PATCH_SHAPE[1]                # 64
DIM = INPUT_SHAPE[0] * DIM_PATCH                           # 256
SEQ = NUM_PATCHES + 1                                      # 5 real tokens
SEQ_PAD = 8                                                # padded to the sublane count
ATTN_DIM = HIDDEN_DIM * NUM_HEADS                          # 64 ("multi-head" is one wide head)
PAD_OUT = 128                                              # lane-dense padded head width

LN_EPS = 1e-5


# ------------------------------ Pallas kernel ------------------------------------------
def _layernorm(z, gamma, beta):
    mu = jnp.mean(z, axis=-1, keepdims=True)
    var = jnp.mean((z - mu) ** 2, axis=-1, keepdims=True)      # biased, like torch LayerNorm
    return (z - mu) * jax.lax.rsqrt(var + LN_EPS) * gamma + beta


def vit_kernel(x_ref,                       # (BT*NUM_PATCHES, DIM)   (f32 or bf16)
               vecs_ref,                    # (16, H) packed per-channel params
               we_ref,                      # patch embedding weight (DIM, H)
               wqkv_ref,                    # (H, 3*ATTN_DIM), no bias
               wo_ref,                      # attention out-proj (ATTN_DIM, H)
               w1_ref, w2_ref,              # MLP weights (H, H) each
               wh_ref, bh_ref,              # head (padded): (H, PAD_OUT), (1, PAD_OUT)
               out_ref,                     # (BT, PAD_OUT)
               seq_ref,                     # VMEM scratch (BT, SEQ_PAD, H)
               *, matmul_dtype):
    bt = out_ref.shape[0]
    f32 = jnp.float32
    mm = matmul_dtype

    # packed per-channel vectors (static row slices of a tiny ref; essentially free)
    be    = vecs_ref[0:1, :]
    g_pre = vecs_ref[1:2, :]
    b_pre = vecs_ref[2:3, :]
    b_o   = vecs_ref[3:4, :]
    g_ln  = vecs_ref[4:5, :]
    b_ln  = vecs_ref[5:6, :]
    b_m1  = vecs_ref[6:7, :]
    b_m2  = vecs_ref[7:8, :]
    posf  = vecs_ref[8:16, :]        # (8, H): row0 = cls+pos[0], rows1-4 = pos[1:5], rows5-7 = 0

    # ---- patch embedding: one (BT*P, DIM) x (DIM, H) matmul --------------------------
    tok = jnp.dot(x_ref[...].astype(mm), we_ref[...].astype(mm),
                  preferred_element_type=f32) + be                       # (BT*P, H) f32

    # ---- assemble padded sequence (SEQ_PAD = 8 rows/image) in scratch ----------------
    seq_ref[...] = jnp.zeros_like(seq_ref)                               # pad rows -> 0 (finite)
    seq_ref[:, 1:SEQ, :] = tok.reshape(bt, NUM_PATCHES, HIDDEN_DIM)
    seq3 = seq_ref[...] + posf[None, :, :]                               # row0 becomes cls+pos0
    seq2 = seq3.reshape(bt * SEQ_PAD, HIDDEN_DIM)                        # layout-preserving

    # ------------------------------- Encoder ------------------------------------------
    y2 = _layernorm(seq2, g_pre, b_pre)

    qkv = jnp.dot(y2.astype(mm), wqkv_ref[...].astype(mm),
                  preferred_element_type=f32)                            # (BT*8, 3A) f32
    qkv3 = qkv.reshape(bt, SEQ_PAD, 3 * ATTN_DIM)                        # layout-preserving
    q3 = qkv3[:, :, 0:ATTN_DIM] * np.float32(1.0 / np.sqrt(ATTN_DIM))    # scale folded into q

    # attention: static VPU unroll over the SEQ real key positions.
    # Pad keys (rows 5..7) are never touched -> no mask needed; pad query rows are never read.
    s = []
    for j in range(SEQ):
        kj = qkv3[:, j:j + 1, ATTN_DIM:2 * ATTN_DIM]                     # (BT, 1, A)
        s.append(jnp.sum(q3 * kj, axis=-1, keepdims=True))               # (BT, 8, 1)
    m = s[0]
    for j in range(1, SEQ):
        m = jnp.maximum(m, s[j])
    den = jnp.zeros((bt, SEQ_PAD, 1), f32)
    att3 = jnp.zeros((bt, SEQ_PAD, ATTN_DIM), f32)
    for j in range(SEQ):
        pj = jnp.exp(s[j] - m)                                           # (BT, 8, 1)
        den = den + pj
        att3 = att3 + pj * qkv3[:, j:j + 1, 2 * ATTN_DIM:3 * ATTN_DIM]   # (BT, 8, A)
    att3 = att3 * pl.reciprocal(den, approx=True)                        # EUP reciprocal
    att2 = att3.reshape(bt * SEQ_PAD, ATTN_DIM)                          # layout-preserving

    att2 = jnp.dot(att2.astype(mm), wo_ref[...].astype(mm),
                   preferred_element_type=f32) + b_o
    y2 = att2 + seq2                                                     # residual
    y2 = _layernorm(y2, g_ln, b_ln)

    # MLP: Linear -> exact erf-GELU (torch default) -> Linear
    h = jnp.dot(y2.astype(mm), w1_ref[...].astype(mm),
                preferred_element_type=f32) + b_m1
    h = 0.5 * h * (1.0 + jax.lax.erf(h * np.float32(1.0 / np.sqrt(2.0))))
    y2 = y2 + jnp.dot(h.astype(mm), w2_ref[...].astype(mm),
                      preferred_element_type=f32) + b_m2

    # -------------------------------- head --------------------------------------------
    # CLS rows = sublane 0 of every 8-row tile: tile-aligned stride-8 select (no stride-5 gather)
    cls_rows = y2.reshape(bt, SEQ_PAD, HIDDEN_DIM)[:, 0, :]              # (BT, H)
    logits = jnp.dot(cls_rows.astype(mm), wh_ref[...].astype(mm),
                     preferred_element_type=f32) + bh_ref[...]           # (BT, PAD_OUT)
    logits = logits - jnp.max(logits, axis=-1, keepdims=True)
    e = jnp.exp(logits)                     # padded lanes carry a -1e30 bias -> exp == 0
    out_ref[...] = e / jnp.sum(e, axis=-1, keepdims=True)                # exact softmax


# --------------------------------- wrapper ----------------------------------------------
def vit_forward(images, params, *, b_tile=512, matmul_dtype=jnp.float32):
    """b_tile: images per grid step (512 is well inside 48 MiB scoped VMEM on every chip gen).
    matmul_dtype: jnp.float32 (exact) or jnp.bfloat16 (MXU operands only; ~2x matmul / DMA win
    on v6e/v7x, elementwise math stays f32 so it is also v5e-safe)."""
    n = images.shape[0]
    # NOTE: the PyTorch module patchifies with a plain reshape(n, num_patches, dim) — matched here.
    patches = images.reshape(n * NUM_PATCHES, DIM).astype(jnp.float32)

    # ---- pick the batch tile -----------------------------------------------------------
    bt = min(b_tile, n)
    if bt >= n:
        if n >= 16:
            # guarantee >= 2 grid blocks so ("parallel",) shards across v7x's two TensorCores
            bt = (((n + 1) // 2) + 7) // 8 * 8
        else:
            bt = n                               # tiny batch: single block (block == full array)
    else:
        bt = max(8, (bt // 8) * 8)               # multi-block grids need bt % 8 == 0
    n_pad = -(-n // bt) * bt
    if n_pad != n:
        patches = jnp.pad(patches, ((0, (n_pad - n) * NUM_PATCHES), (0, 0)))
    patches = patches.astype(matmul_dtype)       # bf16 halves the dominant input-block DMA

    # ---- pack the tiny per-channel params into one (16, H) array ------------------------
    posf = jnp.zeros((SEQ_PAD, HIDDEN_DIM), jnp.float32)
    posf = posf.at[0:1].set(params["class_token"] + params["pos_enc"][0:1])
    posf = posf.at[1:SEQ].set(params["pos_enc"][1:SEQ])
    vecs = jnp.concatenate(
        [params["b_embed"], params["g_pre"], params["b_pre"], params["b_o"],
         params["g_ln"], params["b_ln"], params["b_mlp1"], params["b_mlp2"], posf],
        axis=0)                                                          # (16, H)

    # lane-dense head: pad classifier to PAD_OUT lanes; padded logits get a -1e30 bias so
    # they contribute ~0 to the softmax denominator; wrapper slices them away.
    wh = jnp.zeros((HIDDEN_DIM, PAD_OUT), jnp.float32).at[:, :OUTPUT_DIM].set(params["w_head"])
    bh = jnp.full((1, PAD_OUT), -1e30, jnp.float32).at[:, :OUTPUT_DIM].set(params["b_head"])

    ordered = [vecs, params["w_embed"], params["w_qkv"], params["w_o"],
               params["w_mlp1"], params["w_mlp2"], wh, bh]
    full = lambda a: pl.BlockSpec(a.shape, lambda b, nd=a.ndim: (0,) * nd)

    x_bytes = jnp.dtype(matmul_dtype).itemsize
    flops_per_img = 2 * (NUM_PATCHES * DIM * HIDDEN_DIM
                         + SEQ_PAD * HIDDEN_DIM * 3 * ATTN_DIM
                         + 2 * SEQ * SEQ_PAD * ATTN_DIM
                         + SEQ_PAD * ATTN_DIM * HIDDEN_DIM
                         + 2 * SEQ_PAD * HIDDEN_DIM * HIDDEN_DIM
                         + HIDDEN_DIM * PAD_OUT)
    transc_per_img = SEQ * SEQ_PAD + SEQ_PAD * HIDDEN_DIM + PAD_OUT
    weight_bytes = int(sum(int(np.prod(a.shape)) for a in ordered)) * 4
    cost = pl.CostEstimate(
        flops=int(n_pad * flops_per_img),
        transcendentals=int(n_pad * transc_per_img),
        bytes_accessed=int(n_pad * (NUM_PATCHES * DIM * x_bytes + PAD_OUT * 4) + weight_bytes),
    )

    out = pl.pallas_call(
        partial(vit_kernel, matmul_dtype=matmul_dtype),
        out_shape=jax.ShapeDtypeStruct((n_pad, PAD_OUT), jnp.float32),
        grid_spec=pltpu.PrefetchScalarGridSpec(
            num_scalar_prefetch=0,
            grid=(n_pad // bt,),
            in_specs=[pl.BlockSpec((bt * NUM_PATCHES, DIM), lambda b: (b, 0))]
                     + [full(a) for a in ordered],
            out_specs=pl.BlockSpec((bt, PAD_OUT), lambda b: (b, 0)),
            scratch_shapes=[pltpu.VMEM((bt, SEQ_PAD, HIDDEN_DIM), jnp.float32)],
        ),
        compiler_params=pltpu.CompilerParams(
            dimension_semantics=("parallel",),       # shard batch blocks across TCs on v7x
            vmem_limit_bytes=48 * 1024 * 1024,       # > v5e's 16 MiB scoped default, < v7x's 64 MiB
        ),
        cost_estimate=cost,
    )(patches, *ordered)
    return out[:n, :OUTPUT_DIM]


# ---------------------- deterministic parameter init ------------------------------------
def positional_encodings(seq_len, dim):
    res = np.ones((seq_len, dim), dtype=np.float32)
    for i in range(seq_len):
        for j in range(dim):
            if j % 2 == 0:
                res[i, j] = np.sin(i / 10000 ** (j / dim))
            else:
                res[i, j] = np.cos(i / 10000 ** ((j - 1) / dim))
    return jnp.asarray(res)


def init_params(key):
    ks = jax.random.split(key, 16)

    def linear_w(k, fan_in, fan_out):
        bound = 1.0 / np.sqrt(fan_in)
        return jax.random.uniform(k, (fan_in, fan_out), jnp.float32, -bound, bound)

    def linear_b(k, fan_in, fan_out):
        bound = 1.0 / np.sqrt(fan_in)
        return jax.random.uniform(k, (1, fan_out), jnp.float32, -bound, bound)

    return {
        "w_embed": linear_w(ks[0], DIM, HIDDEN_DIM),
        "b_embed": linear_b(ks[1], DIM, HIDDEN_DIM),
        "class_token": jax.random.uniform(ks[2], (1, HIDDEN_DIM), jnp.float32),
        "pos_enc": positional_encodings(SEQ, HIDDEN_DIM),
        "g_pre": jnp.ones((1, HIDDEN_DIM), jnp.float32),
        "b_pre": jnp.zeros((1, HIDDEN_DIM), jnp.float32),
        "w_qkv": linear_w(ks[3], HIDDEN_DIM, 3 * ATTN_DIM),
        "w_o": linear_w(ks[4], ATTN_DIM, HIDDEN_DIM),
        "b_o": linear_b(ks[5], ATTN_DIM, HIDDEN_DIM),
        "g_ln": jnp.ones((1, HIDDEN_DIM), jnp.float32),
        "b_ln": jnp.zeros((1, HIDDEN_DIM), jnp.float32),
        "w_mlp1": linear_w(ks[6], HIDDEN_DIM, HIDDEN_DIM),
        "b_mlp1": linear_b(ks[7], HIDDEN_DIM, HIDDEN_DIM),
        "w_mlp2": linear_w(ks[8], HIDDEN_DIM, HIDDEN_DIM),
        "b_mlp2": linear_b(ks[9], HIDDEN_DIM, HIDDEN_DIM),
        "w_head": linear_w(ks[10], HIDDEN_DIM, OUTPUT_DIM),
        "b_head": linear_b(ks[11], HIDDEN_DIM, OUTPUT_DIM),
    }


# ----------------------------- pure-JAX reference ----------------------------------------
def vit_reference(images, p):
    n = images.shape[0]
    x = images.reshape(n, NUM_PATCHES, DIM)
    tok = x @ p["w_embed"] + p["b_embed"]
    cls = jnp.broadcast_to(p["class_token"][None], (n, 1, HIDDEN_DIM))
    seq = jnp.concatenate([cls, tok], axis=1) + p["pos_enc"][None]

    def ln(z, g, b):
        mu = jnp.mean(z, -1, keepdims=True)
        var = jnp.mean((z - mu) ** 2, -1, keepdims=True)
        return (z - mu) / jnp.sqrt(var + LN_EPS) * g + b

    y = ln(seq, p["g_pre"], p["b_pre"])
    qkv = y @ p["w_qkv"]
    q, k, v = jnp.split(qkv, 3, axis=-1)
    s = jnp.einsum("bqd,bkd->bqk", q, k) / np.sqrt(ATTN_DIM)
    att = jax.nn.softmax(s, axis=-1) @ v
    y = att @ p["w_o"] + p["b_o"]
    y = y + seq
    y = ln(y, p["g_ln"], p["b_ln"])
    h = y @ p["w_mlp1"] + p["b_mlp1"]
    h = 0.5 * h * (1.0 + jax.lax.erf(h / np.sqrt(2.0)))
    y = y + (h @ p["w_mlp2"] + p["b_mlp2"])
    return jax.nn.softmax(y[:, 0] @ p["w_head"] + p["b_head"], axis=-1)


if __name__ == "__main__":
    key = jax.random.PRNGKey(0)
    k_img, k_par, k_img2 = jax.random.split(key, 3)
    params = init_params(k_par)

    # small test, single grid block (batch=2 as implied by the module usage), f32 matmuls
    images = jax.random.normal(k_img, (2,) + INPUT_SHAPE, jnp.float32)      # (2, 4, 16, 16)
    out = jax.block_until_ready(vit_forward(images, params))
    ref = vit_reference(images, params)
    assert out.shape == (2, OUTPUT_DIM)
    # tolerance loosened from 1e-5 because the attention softmax uses the EUP
    # approximate reciprocal (pl.reciprocal(approx=True)).
    assert np.allclose(np.asarray(out), np.asarray(ref), atol=2e-3, rtol=2e-3)

    # multi-block grid path (batch padding + small B_TILE) sanity check, f32 matmuls
    images2 = jax.random.normal(k_img2, (20,) + INPUT_SHAPE, jnp.float32)
    out2 = jax.block_until_ready(vit_forward(images2, params, b_tile=8))
    ref2 = vit_reference(images2, params)
    assert out2.shape == (20, OUTPUT_DIM)
    assert np.allclose(np.asarray(out2), np.asarray(ref2), atol=2e-3, rtol=2e-3)

    # default b_tile (>= n): batch auto-split into 2 grid blocks (v7x dual-TC path),
    # plus bf16 MXU operands (v6e/v7x throughput path) — looser tolerance.
    out3 = jax.block_until_ready(vit_forward(images2, params, matmul_dtype=jnp.bfloat16))
    assert out3.shape == (20, OUTPUT_DIM)
    assert np.allclose(np.asarray(out3), np.asarray(ref2), atol=3e-2, rtol=3e-2)

    print("KERNEL_OK")
</pallas_src>

<mosaic_0001>
module attributes {stable_mosaic.version = 11 : i64} {
  func.func @vit_kernel(%arg0: i32, %arg1: memref<8x256xf32, #tpu.memory_space<vmem>>, %arg2: memref<16x32xf32, #tpu.memory_space<vmem>>, %arg3: memref<256x32xf32, #tpu.memory_space<vmem>>, %arg4: memref<32x192xf32, #tpu.memory_space<vmem>>, %arg5: memref<64x32xf32, #tpu.memory_space<vmem>>, %arg6: memref<32x32xf32, #tpu.memory_space<vmem>>, %arg7: memref<32x32xf32, #tpu.memory_space<vmem>>, %arg8: memref<32x128xf32, #tpu.memory_space<vmem>>, %arg9: memref<1x128xf32, #tpu.memory_space<vmem>>, %arg10: memref<2x128xf32, #tpu.memory_space<vmem>>, %arg11: memref<2x8x32xf32, #tpu.memory_space<vmem>>) attributes {dimension_semantics = [#tpu.dimension_semantics<parallel>], iteration_bounds = array<i64: 1>, scalar_prefetch = 0 : i64, scratch_operands = 1 : i64, tpu.core_type = #tpu.core_type<tc>, window_params = [{transform_indices = @transform_0, window_bounds = array<i64: 8, 256>}, {pipeline_mode = #tpu.pipeline_mode<synchronous>, transform_indices = @transform_1, window_bounds = array<i64: 16, 32>}, {pipeline_mode = #tpu.pipeline_mode<synchronous>, transform_indices = @transform_2, window_bounds = array<i64: 256, 32>}, {pipeline_mode = #tpu.pipeline_mode<synchronous>, transform_indices = @transform_3, window_bounds = array<i64: 32, 192>}, {pipeline_mode = #tpu.pipeline_mode<synchronous>, transform_indices = @transform_4, window_bounds = array<i64: 64, 32>}, {pipeline_mode = #tpu.pipeline_mode<synchronous>, transform_indices = @transform_5, window_bounds = array<i64: 32, 32>}, {pipeline_mode = #tpu.pipeline_mode<synchronous>, transform_indices = @transform_6, window_bounds = array<i64: 32, 32>}, {pipeline_mode = #tpu.pipeline_mode<synchronous>, transform_indices = @transform_7, window_bounds = array<i64: 32, 128>}, {pipeline_mode = #tpu.pipeline_mode<synchronous>, transform_indices = @transform_8, window_bounds = array<i64: 1, 128>}, {transform_indices = @transform_9, window_bounds = array<i64: 2, 128>}]} {
    %c0 = arith.constant 0 : index
    %c0_0 = arith.constant 0 : index
    %0 = vector.load %arg2[%c0, %c0_0] : memref<16x32xf32, #tpu.memory_space<vmem>>, vector<1x32xf32>
    %c1 = arith.constant 1 : index
    %c0_1 = arith.constant 0 : index
    %1 = vector.load %arg2[%c1, %c0_1] : memref<16x32xf32, #tpu.memory_space<vmem>>, vector<1x32xf32>
    %c2 = arith.constant 2 : index
    %c0_2 = arith.constant 0 : index
    %2 = vector.load %arg2[%c2, %c0_2] : memref<16x32xf32, #tpu.memory_space<vmem>>, vector<1x32xf32>
    %c3 = arith.constant 3 : index
    %c0_3 = arith.constant 0 : index
    %3 = vector.load %arg2[%c3, %c0_3] : memref<16x32xf32, #tpu.memory_space<vmem>>, vector<1x32xf32>
    %c4 = arith.constant 4 : index
    %c0_4 = arith.constant 0 : index
    %4 = vector.load %arg2[%c4, %c0_4] : memref<16x32xf32, #tpu.memory_space<vmem>>, vector<1x32xf32>
    %c5 = arith.constant 5 : index
    %c0_5 = arith.constant 0 : index
    %5 = vector.load %arg2[%c5, %c0_5] : memref<16x32xf32, #tpu.memory_space<vmem>>, vector<1x32xf32>
    %c6 = arith.constant 6 : index
    %c0_6 = arith.constant 0 : index
    %6 = vector.load %arg2[%c6, %c0_6] : memref<16x32xf32, #tpu.memory_space<vmem>>, vector<1x32xf32>
    %c7 = arith.constant 7 : index
    %c0_7 = arith.constant 0 : index
    %7 = vector.load %arg2[%c7, %c0_7] : memref<16x32xf32, #tpu.memory_space<vmem>>, vector<1x32xf32>
    %c8 = arith.constant 8 : index
    %c0_8 = arith.constant 0 : index
    %8 = vector.load %arg2[%c8, %c0_8] : memref<16x32xf32, #tpu.memory_space<vmem>>, vector<8x32xf32>
    %c0_9 = arith.constant 0 : index
    %c0_10 = arith.constant 0 : index
    %9 = vector.load %arg1[%c0_9, %c0_10] : memref<8x256xf32, #tpu.memory_space<vmem>>, vector<8x256xf32>
    %c0_11 = arith.constant 0 : index
    %c0_12 = arith.constant 0 : index
    %10 = vector.load %arg3[%c0_11, %c0_12] : memref<256x32xf32, #tpu.memory_space<vmem>>, vector<256x32xf32>
    %cst = arith.constant dense<0.000000e+00> : vector<8x32xf32>
    %11 = tpu.matmul %9, %10, %cst {dimension_numbers = #tpu.dot_dimension_numbers<[1], [0], [0], [1], [0, 0, 1, 1], [], []>} : vector<8x256xf32>, vector<256x32xf32>, vector<8x32xf32> -> vector<8x32xf32>
    %12 = vector.broadcast %0 : vector<1x32xf32> to vector<8x32xf32>
    %13 = arith.addf %11, %12 : vector<8x32xf32>
    %cst_13 = arith.constant 0.000000e+00 : f32
    %14 = vector.broadcast %cst_13 : f32 to vector<2x8x32xf32>
    %c0_14 = arith.constant 0 : index
    %c0_15 = arith.constant 0 : index
    %c0_16 = arith.constant 0 : index
    %15 = vector.load %arg11[%c0_14, %c0_15, %c0_16] : memref<2x8x32xf32, #tpu.memory_space<vmem>>, vector<2x8x32xf32>
    tpu.vector_store %arg11[%c0_14, %c0_15, %c0_16], %14 {strides = array<i32>} : memref<2x8x32xf32, #tpu.memory_space<vmem>>, vector<2x8x32xf32>,
    %16 = vector.shape_cast %13 : vector<8x32xf32> to vector<2x4x32xf32>
    %c0_17 = arith.constant 0 : index
    %c1_18 = arith.constant 1 : index
    %c0_19 = arith.constant 0 : index
    %17 = vector.load %arg11[%c0_17, %c1_18, %c0_19] : memref<2x8x32xf32, #tpu.memory_space<vmem>>, vector<2x4x32xf32>
    tpu.vector_store %arg11[%c0_17, %c1_18, %c0_19], %16 {strides = array<i32>} : memref<2x8x32xf32, #tpu.memory_space<vmem>>, vector<2x4x32xf32>,
    %c0_20 = arith.constant 0 : index
    %c0_21 = arith.constant 0 : index
    %c0_22 = arith.constant 0 : index
    %18 = vector.load %arg11[%c0_20, %c0_21, %c0_22] : memref<2x8x32xf32, #tpu.memory_space<vmem>>, vector<2x8x32xf32>
    %19 = vector.shape_cast %8 : vector<8x32xf32> to vector<1x8x32xf32>
    %20 = vector.broadcast %19 : vector<1x8x32xf32> to vector<2x8x32xf32>
    %21 = arith.addf %18, %20 : vector<2x8x32xf32>
    %22 = vector.shape_cast %21 : vector<2x8x32xf32> to vector<16x32xf32>
    %cst_23 = arith.constant dense<0.000000e+00> : vector<16xf32>
    %23 = vector.multi_reduction <add>, %22, %cst_23 [1] : vector<16x32xf32> to vector<16xf32>
    %24 = vector.shape_cast %23 : vector<16xf32> to vector<16x1xf32>
    %cst_24 = arith.constant 3.200000e+01 : f32
    %25 = vector.broadcast %cst_24 : f32 to vector<16x1xf32>
    %26 = arith.divf %24, %25 : vector<16x1xf32>
    %27 = vector.broadcast %26 : vector<16x1xf32> to vector<16x32xf32>
    %28 = arith.subf %22, %27 : vector<16x32xf32>
    %29 = arith.mulf %28, %28 : vector<16x32xf32>
    %cst_25 = arith.constant dense<0.000000e+00> : vector<16xf32>
    %30 = vector.multi_reduction <add>, %29, %cst_25 [1] : vector<16x32xf32> to vector<16xf32>
    %31 = vector.shape_cast %30 : vector<16xf32> to vector<16x1xf32>
    %cst_26 = arith.constant 3.200000e+01 : f32
    %32 = vector.broadcast %cst_26 : f32 to vector<16x1xf32>
    %33 = arith.divf %31, %32 : vector<16x1xf32>
    %34 = vector.broadcast %26 : vector<16x1xf32> to vector<16x32xf32>
    %35 = arith.subf %22, %34 : vector<16x32xf32>
    %cst_27 = arith.constant 9.99999974E-6 : f32
    %36 = vector.broadcast %cst_27 : f32 to vector<16x1xf32>
    %37 = arith.addf %33, %36 : vector<16x1xf32>
    %38 = math.rsqrt %37 : vector<16x1xf32>
    %39 = vector.broadcast %38 : vector<16x1xf32> to vector<16x32xf32>
    %40 = arith.mulf %35, %39 : vector<16x32xf32>
    %41 = vector.broadcast %1 : vector<1x32xf32> to vector<16x32xf32>
    %42 = arith.mulf %40, %41 : vector<16x32xf32>
    %43 = vector.broadcast %2 : vector<1x32xf32> to vector<16x32xf32>
    %44 = arith.addf %42, %43 : vector<16x32xf32>
    %c0_28 = arith.constant 0 : index
    %c0_29 = arith.constant 0 : index
    %45 = vector.load %arg4[%c0_28, %c0_29] : memref<32x192xf32, #tpu.memory_space<vmem>>, vector<32x192xf32>
    %cst_30 = arith.constant dense<0.000000e+00> : vector<16x192xf32>
    %46 = tpu.matmul %44, %45, %cst_30 {dimension_numbers = #tpu.dot_dimension_numbers<[1], [0], [0], [1], [0, 0, 1, 1], [], []>} : vector<16x32xf32>, vector<32x192xf32>, vector<16x192xf32> -> vector<16x192xf32>
    %47 = vector.shape_cast %46 : vector<16x192xf32> to vector<2x8x192xf32>
    %48 = vector.extract_strided_slice %47 {offsets = [0, 0, 0], sizes = [2, 8, 64], strides = [1, 1, 1]} : vector<2x8x192xf32> to vector<2x8x64xf32>
    %cst_31 = arith.constant 1.250000e-01 : f32
    %49 = vector.broadcast %cst_31 : f32 to vector<2x8x64xf32>
    %50 = arith.mulf %48, %49 : vector<2x8x64xf32>
    %51 = vector.extract_strided_slice %47 {offsets = [0, 0, 64], sizes = [2, 1, 64], strides = [1, 1, 1]} : vector<2x8x192xf32> to vector<2x1x64xf32>
    %52 = vector.broadcast %51 : vector<2x1x64xf32> to vector<2x8x64xf32>
    %53 = arith.mulf %50, %52 : vector<2x8x64xf32>
    %cst_32 = arith.constant dense<0.000000e+00> : vector<2x8xf32>
    %54 = vector.multi_reduction <add>, %53, %cst_32 [2] : vector<2x8x64xf32> to vector<2x8xf32>
    %55 = vector.shape_cast %54 : vector<2x8xf32> to vector<2x8x1xf32>
    %56 = vector.extract_strided_slice %47 {offsets = [0, 1, 64], sizes = [2, 1, 64], strides = [1, 1, 1]} : vector<2x8x192xf32> to vector<2x1x64xf32>
    %57 = vector.broadcast %56 : vector<2x1x64xf32> to vector<2x8x64xf32>
    %58 = arith.mulf %50, %57 : vector<2x8x64xf32>
    %cst_33 = arith.constant dense<0.000000e+00> : vector<2x8xf32>
    %59 = vector.multi_reduction <add>, %58, %cst_33 [2] : vector<2x8x64xf32> to vector<2x8xf32>
    %60 = vector.shape_cast %59 : vector<2x8xf32> to vector<2x8x1xf32>
    %61 = vector.extract_strided_slice %47 {offsets = [0, 2, 64], sizes = [2, 1, 64], strides = [1, 1, 1]} : vector<2x8x192xf32> to vector<2x1x64xf32>
    %62 = vector.broadcast %61 : vector<2x1x64xf32> to vector<2x8x64xf32>
    %63 = arith.mulf %50, %62 : vector<2x8x64xf32>
    %cst_34 = arith.constant dense<0.000000e+00> : vector<2x8xf32>
    %64 = vector.multi_reduction <add>, %63, %cst_34 [2] : vector<2x8x64xf32> to vector<2x8xf32>
    %65 = vector.shape_cast %64 : vector<2x8xf32> to vector<2x8x1xf32>
    %66 = vector.extract_strided_slice %47 {offsets = [0, 3, 64], sizes = [2, 1, 64], strides = [1, 1, 1]} : vector<2x8x192xf32> to vector<2x1x64xf32>
    %67 = vector.broadcast %66 : vector<2x1x64xf32> to vector<2x8x64xf32>
    %68 = arith.mulf %50, %67 : vector<2x8x64xf32>
    %cst_35 = arith.constant dense<0.000000e+00> : vector<2x8xf32>
    %69 = vector.multi_reduction <add>, %68, %cst_35 [2] : vector<2x8x64xf32> to vector<2x8xf32>
    %70 = vector.shape_cast %69 : vector<2x8xf32> to vector<2x8x1xf32>
    %71 = vector.extract_strided_slice %47 {offsets = [0, 4, 64], sizes = [2, 1, 64], strides = [1, 1, 1]} : vector<2x8x192xf32> to vector<2x1x64xf32>
    %72 = vector.broadcast %71 : vector<2x1x64xf32> to vector<2x8x64xf32>
    %73 = arith.mulf %50, %72 : vector<2x8x64xf32>
    %cst_36 = arith.constant dense<0.000000e+00> : vector<2x8xf32>
    %74 = vector.multi_reduction <add>, %73, %cst_36 [2] : vector<2x8x64xf32> to vector<2x8xf32>
    %75 = vector.shape_cast %74 : vector<2x8xf32> to vector<2x8x1xf32>
    %76 = arith.maximumf %55, %60 : vector<2x8x1xf32>
    %77 = arith.maximumf %76, %65 : vector<2x8x1xf32>
    %78 = arith.maximumf %77, %70 : vector<2x8x1xf32>
    %79 = arith.maximumf %78, %75 : vector<2x8x1xf32>
    %cst_37 = arith.constant 0.000000e+00 : f32
    %80 = vector.broadcast %cst_37 : f32 to vector<2x8x1xf32>
    %cst_38 = arith.constant 0.000000e+00 : f32
    %81 = vector.broadcast %cst_38 : f32 to vector<2x8x64xf32>
    %82 = arith.subf %55, %79 : vector<2x8x1xf32>
    %83 = math.exp %82 : vector<2x8x1xf32>
    %84 = arith.addf %80, %83 : vector<2x8x1xf32>
    %85 = vector.extract_strided_slice %47 {offsets = [0, 0, 128], sizes = [2, 1, 64], strides = [1, 1, 1]} : vector<2x8x192xf32> to vector<2x1x64xf32>
    %86 = vector.broadcast %83 : vector<2x8x1xf32> to vector<2x8x64xf32>
    %87 = vector.broadcast %85 : vector<2x1x64xf32> to vector<2x8x64xf32>
    %88 = arith.mulf %86, %87 : vector<2x8x64xf32>
    %89 = arith.addf %81, %88 : vector<2x8x64xf32>
    %90 = arith.subf %60, %79 : vector<2x8x1xf32>
    %91 = math.exp %90 : vector<2x8x1xf32>
    %92 = arith.addf %84, %91 : vector<2x8x1xf32>
    %93 = vector.extract_strided_slice %47 {offsets = [0, 1, 128], sizes = [2, 1, 64], strides = [1, 1, 1]} : vector<2x8x192xf32> to vector<2x1x64xf32>
    %94 = vector.broadcast %91 : vector<2x8x1xf32> to vector<2x8x64xf32>
    %95 = vector.broadcast %93 : vector<2x1x64xf32> to vector<2x8x64xf32>
    %96 = arith.mulf %94, %95 : vector<2x8x64xf32>
    %97 = arith.addf %89, %96 : vector<2x8x64xf32>
    %98 = arith.subf %65, %79 : vector<2x8x1xf32>
    %99 = math.exp %98 : vector<2x8x1xf32>
    %100 = arith.addf %92, %99 : vector<2x8x1xf32>
    %101 = vector.extract_strided_slice %47 {offsets = [0, 2, 128], sizes = [2, 1, 64], strides = [1, 1, 1]} : vector<2x8x192xf32> to vector<2x1x64xf32>
    %102 = vector.broadcast %99 : vector<2x8x1xf32> to vector<2x8x64xf32>
    %103 = vector.broadcast %101 : vector<2x1x64xf32> to vector<2x8x64xf32>
    %104 = arith.mulf %102, %103 : vector<2x8x64xf32>
    %105 = arith.addf %97, %104 : vector<2x8x64xf32>
    %106 = arith.subf %70, %79 : vector<2x8x1xf32>
    %107 = math.exp %106 : vector<2x8x1xf32>
    %108 = arith.addf %100, %107 : vector<2x8x1xf32>
    %109 = vector.extract_strided_slice %47 {offsets = [0, 3, 128], sizes = [2, 1, 64], strides = [1, 1, 1]} : vector<2x8x192xf32> to vector<2x1x64xf32>
    %110 = vector.broadcast %107 : vector<2x8x1xf32> to vector<2x8x64xf32>
    %111 = vector.broadcast %109 : vector<2x1x64xf32> to vector<2x8x64xf32>
    %112 = arith.mulf %110, %111 : vector<2x8x64xf32>
    %113 = arith.addf %105, %112 : vector<2x8x64xf32>
    %114 = arith.subf %75, %79 : vector<2x8x1xf32>
    %115 = math.exp %114 : vector<2x8x1xf32>
    %116 = arith.addf %108, %115 : vector<2x8x1xf32>
    %117 = vector.extract_strided_slice %47 {offsets = [0, 4, 128], sizes = [2, 1, 64], strides = [1, 1, 1]} : vector<2x8x192xf32> to vector<2x1x64xf32>
    %118 = vector.broadcast %115 : vector<2x8x1xf32> to vector<2x8x64xf32>
    %119 = vector.broadcast %117 : vector<2x1x64xf32> to vector<2x8x64xf32>
    %120 = arith.mulf %118, %119 : vector<2x8x64xf32>
    %121 = arith.addf %113, %120 : vector<2x8x64xf32>
    %122 = tpu.reciprocal %116 {approx = true} : vector<2x8x1xf32> -> vector<2x8x1xf32>
    %123 = vector.broadcast %122 : vector<2x8x1xf32> to vector<2x8x64xf32>
    %124 = arith.mulf %121, %123 : vector<2x8x64xf32>
    %125 = vector.shape_cast %124 : vector<2x8x64xf32> to vector<16x64xf32>
    %c0_39 = arith.constant 0 : index
    %c0_40 = arith.constant 0 : index
    %126 = vector.load %arg5[%c0_39, %c0_40] : memref<64x32xf32, #tpu.memory_space<vmem>>, vector<64x32xf32>
    %cst_41 = arith.constant dense<0.000000e+00> : vector<16x32xf32>
    %127 = tpu.matmul %125, %126, %cst_41 {dimension_numbers = #tpu.dot_dimension_numbers<[1], [0], [0], [1], [0, 0, 1, 1], [], []>} : vector<16x64xf32>, vector<64x32xf32>, vector<16x32xf32> -> vector<16x32xf32>
    %128 = vector.broadcast %3 : vector<1x32xf32> to vector<16x32xf32>
    %129 = arith.addf %127, %128 : vector<16x32xf32>
    %130 = arith.addf %129, %22 : vector<16x32xf32>
    %cst_42 = arith.constant dense<0.000000e+00> : vector<16xf32>
    %131 = vector.multi_reduction <add>, %130, %cst_42 [1] : vector<16x32xf32> to vector<16xf32>
    %132 = vector.shape_cast %131 : vector<16xf32> to vector<16x1xf32>
    %cst_43 = arith.constant 3.200000e+01 : f32
    %133 = vector.broadcast %cst_43 : f32 to vector<16x1xf32>
    %134 = arith.divf %132, %133 : vector<16x1xf32>
    %135 = vector.broadcast %134 : vector<16x1xf32> to vector<16x32xf32>
    %136 = arith.subf %130, %135 : vector<16x32xf32>
    %137 = arith.mulf %136, %136 : vector<16x32xf32>
    %cst_44 = arith.constant dense<0.000000e+00> : vector<16xf32>
    %138 = vector.multi_reduction <add>, %137, %cst_44 [1] : vector<16x32xf32> to vector<16xf32>
    %139 = vector.shape_cast %138 : vector<16xf32> to vector<16x1xf32>
    %cst_45 = arith.constant 3.200000e+01 : f32
    %140 = vector.broadcast %cst_45 : f32 to vector<16x1xf32>
    %141 = arith.divf %139, %140 : vector<16x1xf32>
    %142 = vector.broadcast %134 : vector<16x1xf32> to vector<16x32xf32>
    %143 = arith.subf %130, %142 : vector<16x32xf32>
    %cst_46 = arith.constant 9.99999974E-6 : f32
    %144 = vector.broadcast %cst_46 : f32 to vector<16x1xf32>
    %145 = arith.addf %141, %144 : vector<16x1xf32>
    %146 = math.rsqrt %145 : vector<16x1xf32>
    %147 = vector.broadcast %146 : vector<16x1xf32> to vector<16x32xf32>
    %148 = arith.mulf %143, %147 : vector<16x32xf32>
    %149 = vector.broadcast %4 : vector<1x32xf32> to vector<16x32xf32>
    %150 = arith.mulf %148, %149 : vector<16x32xf32>
    %151 = vector.broadcast %5 : vector<1x32xf32> to vector<16x32xf32>
    %152 = arith.addf %150, %151 : vector<16x32xf32>
    %c0_47 = arith.constant 0 : index
    %c0_48 = arith.constant 0 : index
    %153 = vector.load %arg6[%c0_47, %c0_48] : memref<32x32xf32, #tpu.memory_space<vmem>>, vector<32x32xf32>
    %cst_49 = arith.constant dense<0.000000e+00> : vector<16x32xf32>
    %154 = tpu.matmul %152, %153, %cst_49 {dimension_numbers = #tpu.dot_dimension_numbers<[1], [0], [0], [1], [0, 0, 1, 1], [], []>} : vector<16x32xf32>, vector<32x32xf32>, vector<16x32xf32> -> vector<16x32xf32>
    %155 = vector.broadcast %6 : vector<1x32xf32> to vector<16x32xf32>
    %156 = arith.addf %154, %155 : vector<16x32xf32>
    %cst_50 = arith.constant 5.000000e-01 : f32
    %157 = vector.broadcast %cst_50 : f32 to vector<16x32xf32>
    %158 = arith.mulf %157, %156 : vector<16x32xf32>
    %cst_51 = arith.constant 0.707106769 : f32
    %159 = vector.broadcast %cst_51 : f32 to vector<16x32xf32>
    %160 = arith.mulf %156, %159 : vector<16x32xf32>
    %161 = math.erf %160 : vector<16x32xf32>
    %cst_52 = arith.constant 1.000000e+00 : f32
    %162 = vector.broadcast %cst_52 : f32 to vector<16x32xf32>
    %163 = arith.addf %162, %161 : vector<16x32xf32>
    %164 = arith.mulf %158, %163 : vector<16x32xf32>
    %c0_53 = arith.constant 0 : index
    %c0_54 = arith.constant 0 : index
    %165 = vector.load %arg7[%c0_53, %c0_54] : memref<32x32xf32, #tpu.memory_space<vmem>>, vector<32x32xf32>
    %cst_55 = arith.constant dense<0.000000e+00> : vector<16x32xf32>
    %166 = tpu.matmul %164, %165, %cst_55 {dimension_numbers = #tpu.dot_dimension_numbers<[1], [0], [0], [1], [0, 0, 1, 1], [], []>} : vector<16x32xf32>, vector<32x32xf32>, vector<16x32xf32> -> vector<16x32xf32>
    %167 = arith.addf %152, %166 : vector<16x32xf32>
    %168 = vector.broadcast %7 : vector<1x32xf32> to vector<16x32xf32>
    %169 = arith.addf %167, %168 : vector<16x32xf32>
    %170 = vector.shape_cast %169 : vector<16x32xf32> to vector<2x8x32xf32>
    %171 = vector.extract_strided_slice %170 {offsets = [0, 0, 0], sizes = [2, 1, 32], strides = [1, 1, 1]} : vector<2x8x32xf32> to vector<2x1x32xf32>
    %172 = vector.shape_cast %171 : vector<2x1x32xf32> to vector<2x32xf32>
    %c0_56 = arith.constant 0 : index
    %c0_57 = arith.constant 0 : index
    %173 = vector.load %arg8[%c0_56, %c0_57] : memref<32x128xf32, #tpu.memory_space<vmem>>, vector<32x128xf32>
    %cst_58 = arith.constant dense<0.000000e+00> : vector<2x128xf32>
    %174 = tpu.matmul %172, %173, %cst_58 {dimension_numbers = #tpu.dot_dimension_numbers<[1], [0], [0], [1], [0, 0, 1, 1], [], []>} : vector<2x32xf32>, vector<32x128xf32>, vector<2x128xf32> -> vector<2x128xf32>
    %c0_59 = arith.constant 0 : index
    %c0_60 = arith.constant 0 : index
    %175 = vector.load %arg9[%c0_59, %c0_60] : memref<1x128xf32, #tpu.memory_space<vmem>>, vector<1x128xf32>
    %176 = vector.broadcast %175 : vector<1x128xf32> to vector<2x128xf32>
    %177 = arith.addf %174, %176 : vector<2x128xf32>
    %cst_61 = arith.constant dense<0xFF800000> : vector<2xf32>
    %178 = vector.multi_reduction <maximumf>, %177, %cst_61 [1] : vector<2x128xf32> to vector<2xf32>
    %179 = vector.shape_cast %178 : vector<2xf32> to vector<2x1xf32>
    %180 = vector.broadcast %179 : vector<2x1xf32> to vector<2x128xf32>
    %181 = arith.subf %177, %180 : vector<2x128xf32>
    %182 = math.exp %181 : vector<2x128xf32>
    %cst_62 = arith.constant dense<0.000000e+00> : vector<2xf32>
    %183 = vector.multi_reduction <add>, %182, %cst_62 [1] : vector<2x128xf32> to vector<2xf32>
    %184 = vector.shape_cast %183 : vector<2xf32> to vector<2x1xf32>
    %185 = vector.broadcast %184 : vector<2x1xf32> to vector<2x128xf32>
    %186 = arith.divf %182, %185 : vector<2x128xf32>
    %c0_63 = arith.constant 0 : index
    %c0_64 = arith.constant 0 : index
    %187 = vector.load %arg10[%c0_63, %c0_64] : memref<2x128xf32, #tpu.memory_space<vmem>>, vector<2x128xf32>
    tpu.vector_store %arg10[%c0_63, %c0_64], %186 {strides = array<i32>} : memref<2x128xf32, #tpu.memory_space<vmem>>, vector<2x128xf32>,
    return
  }
  func.func @transform_0(%arg0: i32) -> (i32, i32) {
    %c0_i32 = arith.constant 0 : i32
    %c0_i32_0 = arith.constant 0 : i32
    return %arg0, %c0_i32 : i32, i32
  }
  func.func @transform_1(%arg0: i32) -> (i32, i32) {
    %c0_i32 = arith.constant 0 : i32
    %c0_i32_0 = arith.constant 0 : i32
    %c0_i32_1 = arith.constant 0 : i32
    return %c0_i32, %c0_i32_0 : i32, i32
  }
  func.func @transform_2(%arg0: i32) -> (i32, i32) {
    %c0_i32 = arith.constant 0 : i32
    %c0_i32_0 = arith.constant 0 : i32
    %c0_i32_1 = arith.constant 0 : i32
    return %c0_i32, %c0_i32_0 : i32, i32
  }
  func.func @transform_3(%arg0: i32) -> (i32, i32) {
    %c0_i32 = arith.constant 0 : i32
    %c0_i32_0 = arith.constant 0 : i32
    %c0_i32_1 = arith.constant 0 : i32
    return %c0_i32, %c0_i32_0 : i32, i32
  }
  func.func @transform_4(%arg0: i32) -> (i32, i32) {
    %c0_i32 = arith.constant 0 : i32
    %c0_i32_0 = arith.constant 0 : i32
    %c0_i32_1 = arith.constant 0 : i32
    return %c0_i32, %c0_i32_0 : i32, i32
  }
  func.func @transform_5(%arg0: i32) -> (i32, i32) {
    %c0_i32 = arith.constant 0 : i32
    %c0_i32_0 = arith.constant 0 : i32
    %c0_i32_1 = arith.constant 0 : i32
    return %c0_i32, %c0_i32_0 : i32, i32
  }
  func.func @transform_6(%arg0: i32) -> (i32, i32) {
    %c0_i32 = arith.constant 0 : i32
    %c0_i32_0 = arith.constant 0 : i32
    %c0_i32_1 = arith.constant 0 : i32
    return %c0_i32, %c0_i32_0 : i32, i32
  }
  func.func @transform_7(%arg0: i32) -> (i32, i32) {
    %c0_i32 = arith.constant 0 : i32
    %c0_i32_0 = arith.constant 0 : i32
    %c0_i32_1 = arith.constant 0 : i32
    return %c0_i32, %c0_i32_0 : i32, i32
  }
  func.func @transform_8(%arg0: i32) -> (i32, i32) {
    %c0_i32 = arith.constant 0 : i32
    %c0_i32_0 = arith.constant 0 : i32
    %c0_i32_1 = arith.constant 0 : i32
    return %c0_i32, %c0_i32_0 : i32, i32
  }
  func.func @transform_9(%arg0: i32) -> (i32, i32) {
    %c0_i32 = arith.constant 0 : i32
    %c0_i32_0 = arith.constant 0 : i32
    return %arg0, %c0_i32 : i32, i32
  }
}

</mosaic_0001>

<bundles_post_ra>
// kernel: tpu_custom_call.1
= control target key start
LH: loop header
LB: loop body
LE: loop exit
PB: predicated region body
PF: predicated region fallthrough
CT: control target
= control target key end

     0   :  { %s1539_s0 = inlined_call_operand.vmem [shape: f32[8,256], index: 0, kind: input, shape index: {}]   ;;  %s1540_s1 = inlined_call_operand.vmem [shape: f32[16,32], index: 1, kind: input, shape index: {}]   ;;  %s1541_s2 = inlined_call_operand.vmem [shape: f32[256,32], index: 2, kind: input, shape index: {}]   ;;  %s1542_s3 = inlined_call_operand.vmem [shape: f32[32,192], index: 3, kind: input, shape index: {}]   ;;  %s1543_s4 = inlined_call_operand.vmem [shape: f32[64,32], index: 4, kind: input, shape index: {}]   ;;  %s1544_s5 = inlined_call_operand.vmem [shape: f32[32,32], index: 5, kind: input, shape index: {}]   ;;  %s1545_s6 = inlined_call_operand.vmem [shape: f32[32,32], index: 6, kind: input, shape index: {}]   ;;  %s1546_s7 = inlined_call_operand.vmem [shape: f32[32,128], index: 7, kind: input, shape index: {}]   ;;  %s1547_s8 = inlined_call_operand.vmem [shape: f32[1,128], index: 8, kind: input, shape index: {}]   ;;  %s1548_s9 = inlined_call_operand.hbm [shape: f32[2,128], index: 9, kind: output, shape index: {}]  }
   0x1   :  { %v75_v0 = vld [vmem:[%s1541_s2 + $0xf8] sm:$0xff]  ;;  %v74_v2 = vld [vmem:[%s1541_s2 + $0xf0] sm:$0xff]  ;;  %v73_v4 = vld [vmem:[%s1541_s2 + $0xe8] sm:$0xff] }
   0x2   :  { %v59_v1 = vld [vmem:[%s1541_s2 + $0x78] sm:$0xff]  ;;  %986 = vmatprep.subr.mxu0 %v75_v0  ;;  %v58_v3 = vld [vmem:[%s1541_s2 + $0x70] sm:$0xff]  ;;  %v57_v5 = vld [vmem:[%s1541_s2 + $0x68] sm:$0xff] }
   0x3   :  { %987 = vmatpush3.msra.mxu0 %v59_v1  ;;  %v72_v6 = vld [vmem:[%s1541_s2 + $0xe0] sm:$0xff]  ;;  %v71_v8 = vld [vmem:[%s1541_s2 + $0xd8] sm:$0xff]  ;;  %v70_v10 = vld [vmem:[%s1541_s2 + $0xd0] sm:$0xff] }
   0x4   :  { %988 = vmatprep.subr.mxu0 %v74_v2  ;;  %v56_v7 = vld [vmem:[%s1541_s2 + $0x60] sm:$0xff]  ;;  %v55_v9 = vld [vmem:[%s1541_s2 + $0x58] sm:$0xff]  ;;  %v54_v11 = vld [vmem:[%s1541_s2 + $0x50] sm:$0xff] }
   0x5   :  { %989 = vmatpush3.msra.mxu0 %v58_v3  ;;  %v69_v12 = vld [vmem:[%s1541_s2 + $0xc8] sm:$0xff] }
   0x6   :  { %990 = vmatprep.subr.mxu0 %v73_v4  ;;  %v43_v13 = vld [vmem:[%s1539_s0 + $0x8] sm:$0xff] }
   0x7   :  { %991 = vmatpush3.msra.mxu0 %v57_v5  ;;  %v53_v14 = vld [vmem:[%s1541_s2 + $0x48] sm:$0xff]  ;;  %144 = vmatprep.mubr.f32.mxu0 %v43_v13 }
   0x8   :  { %992 = vmatprep.subr.mxu0 %v72_v6 }
   0x9   :  { %993 = vmatpush3.msra.mxu0 %v56_v7 }
   0xa   :  { %994 = vmatprep.subr.mxu0 %v71_v8 }
   0xb   :  { %995 = vmatpush3.msra.mxu0 %v55_v9 }
   0xc   :  { %996 = vmatprep.subr.mxu0 %v70_v10 }
   0xd   :  { %14 = vsyncpa [#allocation4], 0  ;;  %997 = vmatpush3.msra.mxu0 %v54_v11  ;;  %v68_v15 = vld [vmem:[%s1541_s2 + $0xc0] sm:$0xff]  ;;  %v67_v17 = vld [vmem:[%s1541_s2 + $0xb8] sm:$0xff]  ;;  %vm150_vm0 = vcmask 261120   ;;  %v1166_v34 = vmov 0.0  }
   0xe   :  { %998 = vmatprep.subr.mxu0 %v69_v12  ;;  %v52_v16 = vld [vmem:[%s1541_s2 + $0x40] sm:$0xff]  ;;  %v51_v18 = vld [vmem:[%s1541_s2 + $0x38] sm:$0xff]  ;;  %v66_v19 = vld [vmem:[%s1541_s2 + $0xb0] sm:$0xff]  ;;  %151 = vst.msk [vmem:[#allocation2] sm:$0xff] %vm150_vm0, %v1166_v34  ;;  %280 = vmatprep.mubr.f32.mxu1 %v1166_v34  ;;  %vm156_vm1 = vcmask 257024   ;;  %vm313_vm2 = vcmask 523264  }
   0xf   :  { %999 = vmatpush3.msra.mxu0 %v53_v14  ;;  %v50_v20 = vld [vmem:[%s1541_s2 + $0x30] sm:$0xff]  ;;  %v65_v21 = vld [vmem:[%s1541_s2 + $0xa8] sm:$0xff]  ;;  %v64_v23 = vld [vmem:[%s1541_s2 + $0xa0] sm:$0xff]  ;;  %152 = vst.msk [vmem:[#allocation2 + $0x8] sm:$0xff] %vm150_vm0, %v1166_v34  ;;  %vm1168_vm3 = vmmov 0   ;;  %vm867_vm4 = vcmask 1041409  }
  0x10   :  { %1000 = vmatprep.subr.mxu0 %v68_v15  ;;  %v49_v22 = vld [vmem:[%s1541_s2 + $0x28] sm:$0xff]  ;;  %v48_v24 = vld [vmem:[%s1541_s2 + $0x20] sm:$0xff]  ;;  %v63_v25 = vld [vmem:[%s1541_s2 + $0x98] sm:$0xff]  ;;  %vm941_vm5 = vcmask 1041408  }
  0x11   :  { %1001 = vmatpush3.msra.mxu0 %v52_v16  ;;  %v47_v26 = vld [vmem:[%s1541_s2 + $0x18] sm:$0xff]  ;;  %v62_v27 = vld [vmem:[%s1541_s2 + $0x90] sm:$0xff]  ;;  %v61_v29 = vld [vmem:[%s1541_s2 + $0x88] sm:$0xff] }
  0x12   :  { %1002 = vmatprep.subr.mxu0 %v67_v17  ;;  %v46_v28 = vld [vmem:[%s1541_s2 + $0x10] sm:$0xff]  ;;  %v45_v30 = vld [vmem:[%s1541_s2 + $0x8] sm:$0xff]  ;;  %v60_v31 = vld [vmem:[%s1541_s2 + $0x80] sm:$0xff] }
  0x13   :  { %1003 = vmatpush3.msra.mxu0 %v51_v18  ;;  %v44_v32 = vld [vmem:[%s1541_s2] sm:$0xff]  ;;  %v41_v41 = vld [vmem:[%s1540_s1 + $0x8] sm:$0xff]  ;;  %v209_v58 = vld [vmem:[%s1542_s3 + $0x38] sm:$0xff]  ;;  %v295_v18 = vlaneseq }
  0x14   :  { %1004 = vmatprep.subr.mxu0 %v66_v19  ;;  %v42_v33 = vld [vmem:[%s1539_s0] sm:$0xff]  ;;  %v208_v59 = vld [vmem:[%s1542_s3 + $0x30] sm:$0xff]  ;;  %v207_v60 = vld [vmem:[%s1542_s3 + $0x28] sm:$0xff]  ;;  %240 = vmatprep.subr.mxu1 %v209_v58 }
  0x15   :  { %1005 = vmatpush3.msra.mxu0 %v50_v20  ;;  %v968_v36 = vld [vmem:[%s1540_s1] ss:$0 sm:$0xff]  ;;  %241 = vmatpush1.msra.mxu1 %v208_v59  ;;  %v205_v62 = vld [vmem:[%s1542_s3 + $0x18] sm:$0xff]  ;;  %v204_v63 = vld [vmem:[%s1542_s3 + $0x10] sm:$0xff]  ;;  %v296_v19 = vshrl.u32 %v295_v18, 7 }
  0x16   :  { %1006 = vmatprep.subr.mxu0 %v65_v21  ;;  %v206_v61 = vld [vmem:[%s1542_s3 + $0x20] sm:$0xff]  ;;  %242 = vmatprep.subr.mxu1 %v207_v60  ;;  %v203_v0 = vld [vmem:[%s1542_s3 + $0x8] sm:$0xff]  ;;  %v531_v18 = vld [vmem:[%s1543_s4 + $0x18] sm:$0xff] }
  0x17   :  { %1007 = vmatpush3.msra.mxu0 %v49_v22  ;;  %243 = vmatpush1.msra.mxu1 %v206_v61  ;;  %v202_v1 = vld [vmem:[%s1542_s3] sm:$0xff]  ;;  %v1378_v20 = vsub.s32 0, %v296_v19  ;;  %v1380_v21 = vsub.s32 1, %v296_v19  ;;  %s1167_s3 = smov 64  }
  0x18   :  { %1008 = vmatprep.subr.mxu0 %v64_v23  ;;  %244 = vmatprep.subr.mxu1 %v205_v62  ;;  %v969_v9 = vld [vmem:[%s1540_s1 + $0x1] ss:$0 sm:$0xff]  ;;  %v970_v11 = vld [vmem:[%s1540_s1 + $0x2] ss:$0 sm:$0xff]  ;;  %v1382_v23 = vsub.s32 2, %v296_v19 }
  0x19   :  { %1009 = vmatpush3.msra.mxu0 %v48_v24  ;;  %245 = vmatpush1.msra.mxu1 %v204_v63  ;;  %v1384_v24 = vsub.s32 3, %v296_v19 }
  0x1a   :  { %1010 = vmatprep.subr.mxu0 %v63_v25  ;;  %246 = vmatprep.subr.mxu1 %v203_v0 }
  0x1b   :  { %1011 = vmatpush3.msra.mxu0 %v47_v26  ;;  %247 = vmatpush1.msra.mxu1 %v202_v1 }
  0x1c   :  { %1012 = vmatprep.subr.mxu0 %v62_v27 }
  0x1d   :  { %1013 = vmatpush3.msra.mxu0 %v46_v28  ;;  %v1390_v28 = vsub.s32 4, %v296_v19  ;;  %v530_v19 = vld [vmem:[%s1543_s4 + $0x10] sm:$0xff] }
  0x1e   :  { %1014 = vmatprep.subr.mxu0 %v61_v29 }
  0x1f   :  { %1015 = vmatpush3.msra.mxu0 %v45_v30 }
  0x20   :  { %1016 = vmatprep.subr.mxu0 %v60_v31 }
  0x21   :  { %1017 = vmatpush3.msra.mxu0 %v44_v32 }
  0x22   :  { %145 = vmatmul.mubr.f32.vlgmr.msra.gmra.mxu0 %v42_v33 }
  0xe2   :  { %v1018_v35 = vpop.f32.mrf.mxu0 }
  0xe4   :  { %v1019_v37 = vpop.f32.mrf.mxu0 }
  0xe5   :  { %v1020_v38 = vadd.f32 %v1019_v37, %v1018_v35 }
  0xe7   :  { %v147_v39 = vadd.f32 %v1020_v38, %v968_v36 }
  0xe9   :  { %v154_v40 = vcombine.high %v147_v39, %v147_v39  ;;  %157 = vst.msk [vmem:[#allocation2 + $0x1] sm:$0xf] %vm156_vm1, %v147_v39 }
  0xeb   :  { %158 = vst.msk [vmem:[#allocation2 + $0x9] sm:$0xf] %vm156_vm1, %v154_v40 }
  0xf0   :  { %v159_v42 = vld [vmem:[#allocation2] sm:$0xff] }
  0xf1   :  { %v1333_v43 = vadd.f32 %v159_v42, %v41_v41 }
  0xf2   :  { %v160_v44 = vld [vmem:[#allocation2 + $0x8] sm:$0xff] }
  0xf3   :  { %v163_v45 = vsel %vm150_vm0, %v1333_v43, 0.0  ;;  %v1337_v46 = vadd.f32 %v160_v44, %v41_v41 }
  0xf4   :  { %164 = vadd.xlane.f32.xlu0 %v163_v45 }
  0xf5   :  { %v166_v47 = vsel %vm150_vm0, %v1337_v46, 0.0 }
  0xf8   :  { %167 = vadd.xlane.f32.xlu0 %v166_v47 }
 0x17d   :  { %v165_v48 = vpop.xlane.xlu0 %164 }
 0x17e   :  { %v170_v49 = vmul.f32 0.03125, %v165_v48 }
 0x180   :  { %v172_v50 = vsub.f32 %v1333_v43, %v170_v49 }
 0x181   :  { %v168_v51 = vpop.xlane.xlu0 %167 }
 0x182   :  { %v171_v52 = vmul.f32 0.03125, %v168_v51  ;;  %v174_v53 = vmul.f32 %v172_v50, %v172_v50 }
 0x184   :  { %v173_v54 = vsub.f32 %v1337_v46, %v171_v52  ;;  %v176_v55 = vsel %vm150_vm0, %v174_v53, 0.0 }
 0x185   :  { %177 = vadd.xlane.f32.xlu1 %v176_v55 }
 0x186   :  { %v175_v56 = vmul.f32 %v173_v54, %v173_v54 }
 0x188   :  { %v179_v57 = vsel %vm150_vm0, %v175_v56, 0.0 }
 0x189   :  { %180 = vadd.xlane.f32.xlu1 %v179_v57 }
 0x20e   :  { %v178_v2 = vpop.xlane.xlu1 %177 }
 0x20f   :  { %v182_v3 = vmul.f32 0.03125, %v178_v2 }
 0x211   :  { %v184_v4 = vadd.f32 1e-05, %v182_v3 }
 0x212   :  { %v181_v5 = vpop.xlane.xlu1 %180 }
 0x213   :  { %1104 = vrsqrt.f32 %v184_v4  ;;  %v183_v6 = vmul.f32 0.03125, %v181_v5 }
 0x215   :  { %v185_v7 = vadd.f32 1e-05, %v183_v6 }
 0x217   :  { %1106 = vrsqrt.f32 %v185_v7 }
 0x220   :  { %v1105_v8 = vpop.eup %1104 }
 0x221   :  { %v188_v10 = vmul.f32 %v1105_v8, %v172_v50 }
 0x223   :  { %v194_v12 = vmul.f32 %v969_v9, %v188_v10 }
 0x224   :  { %v1107_v13 = vpop.eup %1106 }
 0x225   :  { %v200_v14 = vadd.f32 %v970_v11, %v194_v12  ;;  %v189_v15 = vmul.f32 %v1107_v13, %v173_v54 }
 0x227   :  { %971 = vmatmul.mubr.msk.f32.vlgmr.msra.gmra.mxu1 %vm150_vm0, %v200_v14  ;;  %v195_v16 = vmul.f32 %v969_v9, %v189_v15  ;;  %v535_v14 = vld [vmem:[%s1543_s4 + $0x38] sm:$0xff]  ;;  %v534_v15 = vld [vmem:[%s1543_s4 + $0x30] sm:$0xff] }
 0x228   :  { %286 = vmatprep.mubr.f32.mxu1 %v1166_v34  ;;  %1048 = vmatprep.subr.mxu1 %v535_v14 }
 0x229   :  { %v201_v17 = vadd.f32 %v970_v11, %v195_v16  ;;  %1049 = vmatpush3.msra.mxu1 %v535_v14  ;;  %v533_v16 = vld [vmem:[%s1543_s4 + $0x28] sm:$0xff] }
 0x22a   :  { %1050 = vmatprep.subr.mxu1 %v534_v15 }
 0x22b   :  { %972 = vmatmul.mubr.msk.f32.gmra.mxu1 %vm150_vm0, %v201_v17  ;;  %v532_v17 = vld [vmem:[%s1543_s4 + $0x20] sm:$0xff] }
 0x22c   :  { %1051 = vmatpush3.msra.mxu1 %v534_v15 }
 0x22d   :  { %1052 = vmatprep.subr.mxu1 %v533_v16 }
 0x22e   :  { %1053 = vmatpush3.msra.mxu1 %v533_v16 }
 0x22f   :  { %1054 = vmatprep.subr.mxu1 %v532_v17 }
 0x230   :  { %1055 = vmatpush3.msra.mxu1 %v532_v17 }
 0x231   :  { %1056 = vmatprep.subr.mxu1 %v531_v18 }
 0x232   :  { %1057 = vmatpush3.msra.mxu1 %v531_v18 }
 0x233   :  { %1058 = vmatprep.subr.mxu1 %v530_v19 }
 0x234   :  { %1059 = vmatpush3.msra.mxu1 %v530_v19 }
 0x2e7   :  { %v282_v22 = vpop.f32.mrf.mxu1 }
 0x2e8   :  { %v298_v25 = vrot.slane %v282_v22, %v1378_v20  ;;  %v323_v26 = vrot.slane %v282_v22, %v1380_v21  ;;  %v347_v36 = vrot.slane %v282_v22, %v1382_v23  ;;  %v371_v38 = vrot.slane %v282_v22, %v1384_v24 }
 0x2e9   :  { %v1388_v27 = vpop.f32.mrf.mxu1  ;;  %v395_v40 = vrot.slane %v282_v22, %v1390_v28  ;;  %v293_v45 = vmul.f32 0.125, %v282_v22  ;;  %v529_v22 = vld [vmem:[%s1543_s4 + $0x8] sm:$0xff] }
 0x2ea   :  { %v435_v29 = vrot.slane %v1388_v27, %v1378_v20  ;;  %v455_v30 = vrot.slane %v1388_v27, %v1380_v21  ;;  %v475_v31 = vrot.slane %v1388_v27, %v1382_v23  ;;  %v495_v32 = vrot.slane %v1388_v27, %v1384_v24  ;;  %305 = vrot.lane.b32.xlu0 %v298_v25, %s1167_s3  ;;  %v528_v25 = vld [vmem:[%s1543_s4] sm:$0xff] }
 0x2eb   :  { %v515_v33 = vrot.slane %v1388_v27, %v1390_v28  ;;  %330 = vrot.lane.b32.xlu1 %v323_v26, %s1167_s3  ;;  %v288_v35 = vpop.f32.mrf.mxu1  ;;  %1060 = vmatprep.subr.mxu1 %v529_v22 }
 0x2ec   :  { %v302_v37 = vrot.slane %v288_v35, %v1378_v20  ;;  %v327_v39 = vrot.slane %v288_v35, %v1380_v21  ;;  %v351_v41 = vrot.slane %v288_v35, %v1382_v23  ;;  %v375_v42 = vrot.slane %v288_v35, %v1384_v24  ;;  %1061 = vmatpush3.msra.mxu1 %v529_v22 }
 0x2ed   :  { %v399_v44 = vrot.slane %v288_v35, %v1390_v28  ;;  %v294_v54 = vmul.f32 0.125, %v288_v35  ;;  %1062 = vmatprep.subr.mxu1 %v528_v25 }
 0x2ee   :  { %354 = vrot.lane.b32.xlu0 %v347_v36, %s1167_s3  ;;  %1063 = vmatpush3.msra.mxu1 %v528_v25 }
 0x2ef   :  { %307 = vrot.lane.b32.xlu1 %v302_v37, %s1167_s3 }
 0x2f2   :  { %378 = vrot.lane.b32.xlu0 %v371_v38, %s1167_s3 }
 0x2f3   :  { %332 = vrot.lane.b32.xlu1 %v327_v39, %s1167_s3 }
 0x2f6   :  { %402 = vrot.lane.b32.xlu0 %v395_v40, %s1167_s3 }
 0x2f7   :  { %356 = vrot.lane.b32.xlu1 %v351_v41, %s1167_s3 }
 0x2fb   :  { %380 = vrot.lane.b32.xlu1 %v375_v42, %s1167_s3 }
 0x2ff   :  { %404 = vrot.lane.b32.xlu1 %v399_v44, %s1167_s3 }
 0x35c   :  { %v306_v47 = vpop.permute.xlu0 %305 }
 0x35d   :  { %v331_v48 = vpop.permute.xlu1 %330  ;;  %v311_v49 = vmul.f32 %v306_v47, %v293_v45 }
 0x35e   :  { %v336_v50 = vmul.f32 %v331_v48, %v293_v45 }
 0x35f   :  { %v314_v51 = vsel %vm313_vm2, %v311_v49, 0.0 }
 0x360   :  { %v338_v52 = vsel %vm313_vm2, %v336_v50, 0.0  ;;  %315 = vadd.xlane.f32.xlu0 %v314_v51  ;;  %v355_v53 = vpop.permute.xlu0 %354 }
 0x361   :  { %339 = vadd.xlane.f32.xlu1 %v338_v52  ;;  %v308_v55 = vpop.permute.xlu1 %307  ;;  %v360_v56 = vmul.f32 %v355_v53, %v293_v45 }
 0x362   :  { %v312_v57 = vmul.f32 %v308_v55, %v294_v54 }
 0x363   :  { %v362_v58 = vsel %vm313_vm2, %v360_v56, 0.0 }
 0x364   :  { %363 = vadd.xlane.f32.xlu0 %v362_v58  ;;  %v379_v60 = vpop.permute.xlu0 %378  ;;  %v317_v62 = vsel %vm313_vm2, %v312_v57, 0.0 }
 0x365   :  { %v333_v59 = vpop.permute.xlu1 %332  ;;  %v384_v1 = vmul.f32 %v379_v60, %v293_v45 }
 0x366   :  { %v337_v61 = vmul.f32 %v333_v59, %v294_v54 }
 0x367   :  { %v386_v8 = vsel %vm313_vm2, %v384_v1, 0.0 }
 0x368   :  { %318 = vadd.xlane.f32.xlu0 %v317_v62  ;;  %v341_v2 = vsel %vm313_vm2, %v337_v61, 0.0  ;;  %v403_v3 = vpop.permute.xlu0 %402 }
 0x369   :  { %v357_v63 = vpop.permute.xlu1 %356  ;;  %v408_v7 = vmul.f32 %v403_v3, %v293_v45 }
 0x36a   :  { %v361_v0 = vmul.f32 %v357_v63, %v294_v54 }
 0x36b   :  { %v410_v12 = vsel %vm313_vm2, %v408_v7, 0.0 }
 0x36c   :  { %v365_v4 = vsel %vm313_vm2, %v361_v0, 0.0  ;;  %342 = vadd.xlane.f32.xlu0 %v341_v2 }
 0x36d   :  { %366 = vadd.xlane.f32.xlu1 %v365_v4  ;;  %v381_v5 = vpop.permute.xlu1 %380 }
 0x36e   :  { %v385_v6 = vmul.f32 %v381_v5, %v294_v54 }
 0x370   :  { %v389_v9 = vsel %vm313_vm2, %v385_v6, 0.0  ;;  %387 = vadd.xlane.f32.xlu0 %v386_v8 }
 0x371   :  { %390 = vadd.xlane.f32.xlu1 %v389_v9  ;;  %v405_v10 = vpop.permute.xlu1 %404 }
 0x372   :  { %v409_v11 = vmul.f32 %v405_v10, %v294_v54  ;;  %v290_v10 = vpop.f32.mrf.mxu1 }
 0x373   :  { %v459_v14 = vrot.slane %v290_v10, %v1380_v21  ;;  %v479_v18 = vrot.slane %v290_v10, %v1382_v23 }
 0x374   :  { %v413_v13 = vsel %vm313_vm2, %v409_v11, 0.0  ;;  %411 = vadd.xlane.f32.xlu0 %v410_v12  ;;  %v439_v12 = vrot.slane %v290_v10, %v1378_v20 }
 0x375   :  { %414 = vadd.xlane.f32.xlu1 %v413_v13 }
 0x3e9   :  { %v316_v26 = vpop.xlane.xlu0 %315 }
 0x3ea   :  { %v340_v37 = vpop.xlane.xlu1 %339 }
 0x3eb   :  { %v416_v41 = vmax.f32 %v316_v26, %v340_v37 }
 0x3ed   :  { %v364_v35 = vpop.xlane.xlu0 %363 }
 0x3ee   :  { %v418_v45 = vmax.f32 %v416_v41, %v364_v35  ;;  %v519_v41 = vrot.slane %v290_v10, %v1390_v28 }
 0x3f1   :  { %v319_v36 = vpop.xlane.xlu0 %318 }
 0x3f5   :  { %v343_v38 = vpop.xlane.xlu0 %342 }
 0x3f6   :  { %v367_v39 = vpop.xlane.xlu1 %366  ;;  %v417_v40 = vmax.f32 %v319_v36, %v343_v38 }
 0x3f8   :  { %v419_v42 = vmax.f32 %v417_v40, %v367_v39 }
 0x3f9   :  { %v388_v44 = vpop.xlane.xlu0 %387 }
 0x3fa   :  { %v391_v47 = vpop.xlane.xlu1 %390  ;;  %v420_v48 = vmax.f32 %v418_v45, %v388_v44 }
 0x3fb   :  { %v421_v49 = vmax.f32 %v419_v42, %v391_v47 }
 0x3fd   :  { %v412_v50 = vpop.xlane.xlu0 %411 }
 0x3fe   :  { %v415_v51 = vpop.xlane.xlu1 %414  ;;  %v422_v52 = vmax.f32 %v420_v48, %v412_v50 }
 0x3ff   :  { %v423_v53 = vmax.f32 %v421_v49, %v415_v51 }
 0x400   :  { %v424_v54 = vsub.f32 %v316_v26, %v422_v52  ;;  %v444_v61 = vsub.f32 %v340_v37, %v422_v52  ;;  %v464_v1 = vsub.f32 %v364_v35, %v422_v52  ;;  %v484_v3 = vsub.f32 %v388_v44, %v422_v52 }
 0x401   :  { %v425_v55 = vsub.f32 %v319_v36, %v423_v53  ;;  %v445_v56 = vsub.f32 %v343_v38, %v423_v53  ;;  %v465_v57 = vsub.f32 %v367_v39, %v423_v53  ;;  %v485_v58 = vsub.f32 %v391_v47, %v423_v53 }
 0x402   :  { %v505_v59 = vsub.f32 %v415_v51, %v423_v53  ;;  %v426_v60 = vmul.f32 1.442695, %v424_v54  ;;  %v446_v5 = vmul.f32 1.442695, %v444_v61  ;;  %v504_v6 = vsub.f32 %v412_v50, %v422_v52 }
 0x403   :  { %v428_v62 = vmul.f32 1.442695, %v425_v55  ;;  %v448_v63 = vmul.f32 1.442695, %v445_v56  ;;  %v468_v0 = vmul.f32 1.442695, %v465_v57  ;;  %v499_v26 = vrot.slane %v290_v10, %v1384_v24 }
 0x404   :  { %v488_v2 = vmul.f32 1.442695, %v485_v58  ;;  %1108 = vpow2.f32 %v426_v60  ;;  %v508_v4 = vmul.f32 1.442695, %v505_v59  ;;  %v466_v7 = vmul.f32 1.442695, %v464_v1 }
 0x405   :  { %1110 = vpow2.f32 %v428_v62  ;;  %v486_v8 = vmul.f32 1.442695, %v484_v3  ;;  %v506_v9 = vmul.f32 1.442695, %v504_v6  ;;  %v973_v24 = vld [vmem:[%s1540_s1 + $0x3] ss:$0 sm:$0xff] }
 0x406   :  { %1112 = vpow2.f32 %v448_v63 }
 0x407   :  { %1114 = vpow2.f32 %v468_v0 }
 0x408   :  { %1116 = vpow2.f32 %v488_v2 }
 0x409   :  { %1118 = vpow2.f32 %v508_v4 }
 0x40a   :  { %1120 = vpow2.f32 %v446_v5 }
 0x40b   :  { %1122 = vpow2.f32 %v466_v7 }
 0x40c   :  { %1124 = vpow2.f32 %v486_v8 }
 0x40d   :  { %1126 = vpow2.f32 %v506_v9 }
 0x411   :  { %v1109_v11 = vpop.eup %1108 }
 0x412   :  { %v1111_v13 = vpop.eup %1110  ;;  %v440_v39 = vmul.f32 %v1109_v11, %v435_v29 }
 0x413   :  { %v1113_v15 = vpop.eup %1112  ;;  %v441_v16 = vmul.f32 %v1111_v13, %v439_v12 }
 0x414   :  { %v1115_v17 = vpop.eup %1114  ;;  %v451_v19 = vadd.f32 %v1113_v15, %v1111_v13  ;;  %v461_v22 = vmul.f32 %v1113_v15, %v459_v14  ;;  %v663_v13 = vld [vmem:[%s1544_s5 + $0x10] sm:$0xff]  ;;  %v662_v14 = vld [vmem:[%s1544_s5 + $0x8] sm:$0xff]  ;;  %v661_v15 = vld [vmem:[%s1544_s5] sm:$0xff] }
 0x415   :  { %v1117_v25 = vpop.eup %1116  ;;  %v481_v38 = vmul.f32 %v1115_v17, %v479_v18 }
 0x416   :  { %v1119_v35 = vpop.eup %1118  ;;  %v463_v36 = vadd.f32 %v461_v22, %v441_v16  ;;  %v471_v37 = vadd.f32 %v1115_v17, %v451_v19  ;;  %v501_v42 = vmul.f32 %v1117_v25, %v499_v26 }
 0x417   :  { %v1121_v40 = vpop.eup %1120  ;;  %v521_v51 = vmul.f32 %v1119_v35, %v519_v41 }
 0x418   :  { %v1123_v44 = vpop.eup %1122  ;;  %v483_v45 = vadd.f32 %v481_v38, %v463_v36  ;;  %v491_v47 = vadd.f32 %v1117_v25, %v471_v37  ;;  %v450_v48 = vadd.f32 %v1121_v40, %v1109_v11  ;;  %v460_v49 = vmul.f32 %v1121_v40, %v455_v30  ;;  %v977_v40 = vld [vmem:[%s1540_s1 + $0x5] ss:$0 sm:$0xff] }
 0x419   :  { %v1125_v50 = vpop.eup %1124  ;;  %v480_v52 = vmul.f32 %v1123_v44, %v475_v31 }
 0x41a   :  { %v503_v20 = vadd.f32 %v501_v42, %v483_v45  ;;  %v511_v29 = vadd.f32 %v1119_v35, %v491_v47  ;;  %v470_v53 = vadd.f32 %v1123_v44, %v450_v48  ;;  %v462_v54 = vadd.f32 %v460_v49, %v440_v39  ;;  %v1127_v55 = vpop.eup %1126  ;;  %v976_v35 = vld [vmem:[%s1540_s1 + $0x4] ss:$0 sm:$0xff]  ;;  %v763_v45 = vld [vmem:[%s1545_s6 + $0x18] sm:$0xff]  ;;  %v762_v47 = vld [vmem:[%s1545_s6 + $0x10] sm:$0xff] }
 0x41b   :  { %v500_v59 = vmul.f32 %v1125_v50, %v495_v32  ;;  %v520_v23 = vmul.f32 %v1127_v55, %v515_v33  ;;  %1078 = vmatprep.subr.mxu0 %v763_v45  ;;  %v761_v48 = vld [vmem:[%s1545_s6 + $0x8] sm:$0xff]  ;;  %v760_v49 = vld [vmem:[%s1545_s6] sm:$0xff] }
 0x41c   :  { %v523_v56 = vadd.f32 %v521_v51, %v503_v20  ;;  %v490_v57 = vadd.f32 %v1125_v50, %v470_v53  ;;  %v482_v58 = vadd.f32 %v480_v52, %v462_v54  ;;  %1128 = vrcp.f32 %v511_v29  ;;  %1079 = vmatpush3.msra.mxu0 %v763_v45  ;;  %v978_v50 = vld [vmem:[%s1540_s1 + $0x6] ss:$0 sm:$0xff] }
 0x41d   :  { %1080 = vmatprep.subr.mxu0 %v762_v47 }
 0x41e   :  { %v510_v21 = vadd.f32 %v1127_v55, %v490_v57  ;;  %v502_v30 = vadd.f32 %v500_v59, %v482_v58  ;;  %1081 = vmatpush3.msra.mxu0 %v762_v47 }
 0x41f   :  { %1082 = vmatprep.subr.mxu0 %v761_v48 }
 0x420   :  { %1130 = vrcp.f32 %v510_v21  ;;  %v522_v31 = vadd.f32 %v520_v23, %v502_v30  ;;  %1083 = vmatpush3.msra.mxu0 %v761_v48 }
 0x421   :  { %1084 = vmatprep.subr.mxu0 %v760_v49 }
 0x422   :  { %1085 = vmatpush3.msra.mxu0 %v760_v49 }
 0x429   :  { %v1129_v60 = vpop.eup %1128 }
 0x42a   :  { %v527_v62 = vmul.f32 %v1129_v60, %v523_v56  ;;  %v855_v60 = vld [vmem:[%s1546_s7 + $0x10] sm:$0xff] }
 0x42d   :  { %v1131_v61 = vpop.eup %1130 }
 0x42e   :  { %v526_v63 = vmul.f32 %v1131_v61, %v522_v31  ;;  %v856_v31 = vld [vmem:[%s1546_s7 + $0x18] sm:$0xff]  ;;  %v854_v61 = vld [vmem:[%s1546_s7 + $0x8] sm:$0xff] }
 0x430   :  { %1064 = vmatprep.mubr.msk.f32.mxu1 %vm313_vm2, %v526_v63  ;;  %v983_v63 = vld [vmem:[%s1540_s1 + $0x7] ss:$0 sm:$0xff]  ;;  %s1169_s1 = smov [#allocation3]  }
 0x431   :  { %1065 = vmatmul.mubr.msk.f32.vlgmr.msra.gmra.mxu1 %vm313_vm2, %v527_v62  ;;  %v853_v62 = vld [vmem:[%s1546_s7] sm:$0xff]  ;;  %s960_s3 = sshll.u32 %s1169_s1, 4  ;;  %s961_s3 = int_to_ptr.vmem [resolvable:$true] %s960_s3 }
 0x432   :  { %p1149_p1 = scmp.lt.s32.totalorder %s961_s3, %s961_s3 }
 0x4f1   :  { %v1066_v32 = vpop.f32.mrf.mxu1 }
 0x4f2   :  { %v618_v0 = vadd.f32 %v1066_v32, %v973_v24 }
 0x4f3   :  { %v612_v1 = vpop.f32.mrf.mxu1 }
 0x4f4   :  { %v613_v2 = vadd.f32 %v973_v24, %v612_v1  ;;  %v622_v27 = vadd.f32 %v618_v0, %v1337_v46 }
 0x4f6   :  { %v626_v28 = vsel %vm150_vm0, %v622_v27, 0.0  ;;  %v621_v33 = vadd.f32 %v613_v2, %v1333_v43  ;;  %v664_v43 = vld [vmem:[%s1544_s5 + $0x18] sm:$0xff] }
 0x4f7   :  { %627 = vadd.xlane.f32.xlu1 %v626_v28  ;;  %1067 = vmatprep.subr.mxu1 %v664_v43 }
 0x4f8   :  { %v623_v3 = vsel %vm150_vm0, %v621_v33, 0.0  ;;  %1068 = vmatpush3.msra.mxu1 %v664_v43 }
 0x4f9   :  { %624 = vadd.xlane.f32.xlu0 %v623_v3  ;;  %1069 = vmatprep.subr.mxu1 %v663_v13 }
 0x4fa   :  { %1070 = vmatpush3.msra.mxu1 %v663_v13 }
 0x4fb   :  { %1071 = vmatprep.subr.mxu1 %v662_v14 }
 0x4fc   :  { %1072 = vmatpush3.msra.mxu1 %v662_v14 }
 0x4fd   :  { %1073 = vmatprep.subr.mxu1 %v661_v15 }
 0x4fe   :  { %1074 = vmatpush3.msra.mxu1 %v661_v15 }
 0x4ff   :  { %1089 = vmatprep.subr.mxu1 %v1166_v34 }
 0x580   :  { %v628_v4 = vpop.xlane.xlu1 %627 }
 0x581   :  { %v630_v5 = vmul.f32 0.03125, %v628_v4 }
 0x582   :  { %v625_v6 = vpop.xlane.xlu0 %624 }
 0x583   :  { %v632_v7 = vsub.f32 %v622_v27, %v630_v5  ;;  %v629_v8 = vmul.f32 0.03125, %v625_v6 }
 0x585   :  { %v631_v9 = vsub.f32 %v621_v33, %v629_v8  ;;  %v634_v10 = vmul.f32 %v632_v7, %v632_v7 }
 0x587   :  { %v638_v11 = vsel %vm150_vm0, %v634_v10, 0.0  ;;  %v633_v12 = vmul.f32 %v631_v9, %v631_v9 }
 0x588   :  { %639 = vadd.xlane.f32.xlu1 %v638_v11 }
 0x589   :  { %v635_v46 = vsel %vm150_vm0, %v633_v12, 0.0 }
 0x58a   :  { %636 = vadd.xlane.f32.xlu0 %v635_v46 }
 0x611   :  { %v640_v16 = vpop.xlane.xlu1 %639 }
 0x612   :  { %v642_v17 = vmul.f32 0.03125, %v640_v16 }
 0x613   :  { %v637_v18 = vpop.xlane.xlu0 %636 }
 0x614   :  { %v644_v19 = vadd.f32 1e-05, %v642_v17  ;;  %v641_v22 = vmul.f32 0.03125, %v637_v18 }
 0x616   :  { %1132 = vrsqrt.f32 %v644_v19  ;;  %v643_v25 = vadd.f32 1e-05, %v641_v22 }
 0x618   :  { %1134 = vrsqrt.f32 %v643_v25 }
 0x623   :  { %v1133_v26 = vpop.eup %1132 }
 0x624   :  { %v648_v36 = vmul.f32 %v1133_v26, %v632_v7 }
 0x625   :  { %v1135_v37 = vpop.eup %1134 }
 0x626   :  { %v647_v38 = vmul.f32 %v1135_v37, %v631_v9  ;;  %v654_v39 = vmul.f32 %v976_v35, %v648_v36 }
 0x628   :  { %v653_v41 = vmul.f32 %v976_v35, %v647_v38  ;;  %v660_v44 = vadd.f32 %v977_v40, %v654_v39 }
 0x62a   :  { %v659_v42 = vadd.f32 %v977_v40, %v653_v41 }
 0x62c   :  { %1075 = vmatprep.mubr.msk.f32.mxu1 %vm150_vm0, %v659_v42 }
 0x62d   :  { %1076 = vmatmul.mubr.msk.f32.vlgmr.msra.gmra.mxu1 %vm150_vm0, %v660_v44 }
 0x62e   :  { %1090 = vmatpush3.msra.mxu1 %v856_v31  ;;  %1097 = vmatprep.mubr.msk.f32.mxu1 %vm1168_vm3, %v1166_v34 }
 0x62f   :  { %1091 = vmatprep.subr.mxu1 %v1166_v34 }
 0x630   :  { %1092 = vmatpush3.msra.mxu1 %v855_v60 }
 0x631   :  { %1093 = vmatprep.subr.mxu1 %v1166_v34 }
 0x632   :  { %1094 = vmatpush3.msra.mxu1 %v854_v61 }
 0x633   :  { %1095 = vmatprep.subr.mxu1 %v1166_v34  ;;  %v984_v34 = vld [vmem:[%s1547_s8] ss:$0 sm:$0xff]  ;;  %s1144_s8 = scalar_lea.vmem %s961_s3, 32 }
 0x634   :  { %1096 = vmatpush3.msra.mxu1 %v853_v62  ;;  %p1145_p0 = scmp.ne.s32.totalorder %s961_s3, %s1144_s8  ;;  %p1150_p2 = scmp.lt.s32.totalorder %s1144_s8, %s1144_s8 }
 0x636   :  { %p1151_p3 = por %p1150_p2, %p1149_p1 }
 0x638   :  { %p1152_p4 = pnand %p1151_p3, %p1145_p0 }
 0x6ed   :  { %v1077_v51 = vpop.f32.mrf.mxu1 }
 0x6ee   :  { %v747_v52 = vadd.f32 %v1077_v51, %v978_v50 }
 0x6ef   :  { %v741_v20 = vpop.f32.mrf.mxu1 }
 0x6f0   :  { %v753_v29 = vmul.f32 0.70710677, %v747_v52  ;;  %v742_v53 = vadd.f32 %v978_v50, %v741_v20  ;;  %v751_v21 = vmul.f32 0.5, %v747_v52 }
 0x6f2   :  { %1136 = verf.f32 %v753_v29  ;;  %v752_v54 = vmul.f32 0.70710677, %v742_v53  ;;  %v750_v58 = vmul.f32 0.5, %v742_v53 }
 0x6f4   :  { %1138 = verf.f32 %v752_v54 }
 0x6ff   :  { %v1137_v55 = vpop.eup %1136 }
 0x700   :  { %v757_v57 = vadd.f32 1.0, %v1137_v55 }
 0x701   :  { %v1139_v56 = vpop.eup %1138 }
 0x702   :  { %v756_v59 = vadd.f32 1.0, %v1139_v56  ;;  %v759_v23 = vmul.f32 %v757_v57, %v751_v21 }
 0x704   :  { %v758_v30 = vmul.f32 %v756_v59, %v750_v58 }
 0x706   :  { %1086 = vmatprep.mubr.msk.f32.mxu0 %vm150_vm0, %v758_v30 }
 0x707   :  { %1087 = vmatmul.mubr.msk.f32.vlgmr.msra.gmra.mxu0 %vm150_vm0, %v759_v23 }
 0x7c7   :  { %v1088_v24 = vpop.f32.mrf.mxu0 }
 0x7c8   :  { %v846_v32 = vadd.f32 %v1088_v24, %v660_v44 }
 0x7c9   :  { %v836_v0 = vpop.f32.mrf.mxu0 }
 0x7ca   :  { %v852_v1 = vadd.f32 %v983_v63, %v846_v32  ;;  %v845_v2 = vadd.f32 %v836_v0, %v659_v42 }
 0x7cc   :  { %v866_v27 = vrot.slane %v852_v1, 7  ;;  %v851_v28 = vadd.f32 %v983_v63, %v845_v2 }
 0x7ce   :  { %v868_v33 = vsel %vm867_vm4, %v866_v27, %v851_v28 }
 0x7cf   :  { %1098 = vmatmul.mubr.msk.f32.vlgmr.msra.gmra.mxu1 %vm150_vm0, %v868_v33 }
 0x88f   :  { %v937_v3 = vpop.f32.mrf.mxu1 }
 0x890   :  { %v938_v4 = vadd.f32 %v984_v34, %v937_v3 }
 0x891   :  { %v1099_v5 = vpop.f32.mrf.mxu1 }
 0x892   :  { %v942_v6 = vsel %vm941_vm5, %v938_v4, -inf }
 0x893   :  { %943 = vmax.xlane.f32.xlu0 %v942_v6 }
 0x91c   :  { %v944_v7 = vpop.xlane.xlu0 %943 }
 0x91d   :  { %v945_v8 = vsub.f32 %v938_v4, %v944_v7 }
 0x91f   :  { %v946_v9 = vmul.f32 1.442695, %v945_v8 }
 0x921   :  { %1140 = vpow2.f32 %v946_v9 }
 0x92e   :  { %v1141_v10 = vpop.eup %1140 }
 0x92f   :  { %v948_v11 = vsel %vm941_vm5, %v1141_v10, 0.0 }
 0x930   :  { %949 = vadd.xlane.f32.xlu1 %v948_v11 }
 0x9b9   :  { %v950_v12 = vpop.xlane.xlu1 %949 }
 0x9ba   :  { %1142 = vrcp.f32 %v950_v12 }
 0x9c7   :  { %v1143_v46 = vpop.eup %1142 }
 0x9c8   :  { %v952_v43 = vmul.f32 %v1143_v46, %v1141_v10 }
 0x9ca   :  { %953 = vst [vmem:[#allocation3] sm:$0x3] %v952_v43 }
 0x9cb   :  { %1155 = shalt.err (!%p1152_p4)
}
 0x9cc   :  { %963 = dma.vmem_to_hbm [thread:$0]  %s961_s3, 32, %s1548_s9, [#allocation4]  }
 0x9cd   :  { %1164 = dma.done.wait [#allocation4], 32  }
 0x9ce   :  { %1165 = vsyncadd [#allocation4], 4294967264 }
 0x9cf   :  { %967 = vsyncpa [#allocation4], 1 }

</bundles_post_ra>
